<compile_context>
chip_gen: v7x
topology: tpu7x:2x2x1
jax: 0.10.0
libtpu: 0.0.40
codegen_flags: <defaults>
</compile_context>

<pallas_src>
import functools

import jax
import jax.numpy as jnp
from jax.experimental import pallas as pl
from jax.experimental.pallas import tpu as pltpu


# ----------------------------- Pallas kernels ------------------------------ #

def _make_convt_stats_kernel(phase_taps):
    """Sub-pixel ConvTranspose2d + fused BatchNorm partial statistics.

    phase_taps: static tuple over output phases; each entry is a tuple of
    (weight_index, slab_index) pairs describing which (Cout, Cin) weight slice
    multiplies which pre-shifted input slab for that phase.
    """

    def kernel(xs_ref, w_ref, y_ref, stats_ref, acc_ref):
        # xs_ref   : (n_slab, Cin, H*W)   bf16  shifted input views (one batch elem)
        # w_ref    : (K*K, Cout, Cin)     bf16  per-tap weight slices
        # y_ref    : (S2, Cout, H*W)      bf16  conv output, phase-major (out)
        # stats_ref: (Cout, 2)            f32   [sum, sum-of-squares] partials (out)
        # acc_ref  : (S2, Cout, H*W)      f32   VMEM accumulator (scratch)
        for ph, taps in enumerate(phase_taps):
            for i, (e, m) in enumerate(taps):
                part = jnp.dot(w_ref[e], xs_ref[m],
                               preferred_element_type=jnp.float32)   # (Cout, H*W)
                if i == 0:
                    acc_ref[ph, :, :] = part
                else:
                    acc_ref[ph, :, :] += part
        acc = acc_ref[...]                                   # (S2, Cout, H*W) f32
        y_ref[...] = acc.astype(y_ref.dtype)
        tot = jnp.sum(acc, axis=0)                           # (Cout, H*W)
        tot_sq = jnp.sum(acc * acc, axis=0)                  # (Cout, H*W)
        stats_ref[:, 0:1] = jnp.sum(tot, axis=1, keepdims=True)
        stats_ref[:, 1:2] = jnp.sum(tot_sq, axis=1, keepdims=True)

    return kernel


def _bn_relu_kernel(y_ref, scale_ref, shift_ref, o_ref):
    # y_ref: (Cout, H*W) bf16, scale/shift: (Cout, 1) f32, o_ref: (Cout, H*W) f32
    y = y_ref[...].astype(jnp.float32)
    o_ref[...] = jnp.maximum(y * scale_ref[...] + shift_ref[...], 0.0)


# ------------------------------ tap geometry -------------------------------- #

def _taps_1d(kernel_size, stride, padding):
    """Per output phase r in [0, stride): list of (kernel tap k, window start).

    ConvTranspose output index o = stride*a + r receives x[a - j] * w[k] with
    k = stride*j + r + padding.  `start` is the offset of the length-H window
    inside the zero-padded input.
    """
    K, s, p = kernel_size, stride, padding
    pad_lo = (K - 1 - p) // s
    pad_hi = (s - 1 + p) // s
    taps = []
    for r in range(s):
        j_min = -((r + p) // s)
        j_max = (K - 1 - r - p) // s
        taps.append([(s * j + r + p, pad_lo - j) for j in range(j_min, j_max + 1)])
    return pad_lo, pad_hi, taps


# ------------------------------- wrapper ----------------------------------- #

def generator_decoder_block(x, weight, bias, gamma, beta, *, stride,
                            kernel_size=4, padding=1, eps=1e-5):
    """Forward of GeneratorDecoderBlock (ConvTranspose2d + BatchNorm2d(train) + ReLU).

    x      : (N, Cin, H, W) f32, NCHW (same as the PyTorch module)
    weight : (Cin, Cout, K, K) f32 (PyTorch ConvTranspose2d layout)
    bias   : (Cout,) f32 -- accepted but unused: train-mode BatchNorm subtracts the
             per-channel batch mean right after the conv, which cancels a constant
             per-channel bias exactly.
    gamma, beta : (Cout,) BatchNorm2d affine parameters.
    """
    N, Cin, H, W = x.shape
    Cin_w, Cout, K, K2 = weight.shape
    assert Cin == Cin_w and K == K2 == kernel_size
    s, p = stride, padding
    Ho = (H - 1) * s - 2 * p + K
    Wo = (W - 1) * s - 2 * p + K
    if K != s + 2 * p:
        # TODO(synk): configs where the output is not an exact stride-fold of the
        # input (K != stride + 2*padding) need ragged per-phase tiling; only the
        # standard DCGAN upsampling configuration (e.g. k=4, s=2, p=1) is handled.
        raise NotImplementedError("requires kernel_size == stride + 2*padding")
    assert Ho == s * H and Wo == s * W

    HW = H * W
    S2 = s * s

    # ---- static sub-pixel tap geometry (pure Python) ----
    pad_lo, pad_hi, taps = _taps_1d(K, s, p)

    slab_index = {}
    slab_list = []          # (row_start, col_start) of each shifted input view
    w_slices = []           # (Cout, Cin) weight slice per tap
    phase_taps = []         # per phase: tuple of (weight index, slab index)
    for rh in range(s):
        for rw in range(s):
            lst = []
            for kh, r0 in taps[rh]:
                for kw, c0 in taps[rw]:
                    key = (r0, c0)
                    if key not in slab_index:
                        slab_index[key] = len(slab_list)
                        slab_list.append(key)
                    w_slices.append(weight[:, :, kh, kw].T)      # (Cout, Cin)
                    lst.append((len(w_slices) - 1, slab_index[key]))
            phase_taps.append(tuple(lst))
    phase_taps = tuple(phase_taps)
    n_slab = len(slab_list)
    KK = len(w_slices)                                           # == K*K

    # ---- cheap JAX-side layout prep: bf16 shifted views of the padded input ----
    xpad = jnp.pad(x.astype(jnp.bfloat16),
                   ((0, 0), (0, 0), (pad_lo, pad_hi), (pad_lo, pad_hi)))
    xs = jnp.stack([xpad[:, :, r0:r0 + H, c0:c0 + W].reshape(N, Cin, HW)
                    for r0, c0 in slab_list], axis=1)            # (N, n_slab, Cin, HW)
    w_all = jnp.stack(w_slices, axis=0).astype(jnp.bfloat16)     # (KK, Cout, Cin)

    # ---- kernel 1: sub-pixel ConvTranspose (MXU) + fused BN partial stats ----
    conv_kernel = _make_convt_stats_kernel(phase_taps)
    y, stats = pl.pallas_call(
        conv_kernel,
        out_shape=(jax.ShapeDtypeStruct((N, S2, Cout, HW), jnp.bfloat16),
                   jax.ShapeDtypeStruct((N, Cout, 2), jnp.float32)),
        grid_spec=pltpu.PrefetchScalarGridSpec(
            num_scalar_prefetch=0,
            grid=(N,),
            in_specs=[pl.BlockSpec((None, n_slab, Cin, HW), lambda n: (n, 0, 0, 0)),
                      pl.BlockSpec((KK, Cout, Cin), lambda n: (0, 0, 0))],
            out_specs=(pl.BlockSpec((None, S2, Cout, HW), lambda n: (n, 0, 0, 0)),
                       pl.BlockSpec((None, Cout, 2), lambda n: (n, 0, 0))),
            scratch_shapes=[pltpu.VMEM((S2, Cout, HW), jnp.float32)]),
        compiler_params=pltpu.CompilerParams(dimension_semantics=("parallel",)),
    )(xs, w_all)

    # ---- BN batch statistics -> per-channel scale/shift (tiny, plain JAX) ----
    count = float(N * S2 * HW)                                   # = N * Ho * Wo
    ssum = jnp.sum(stats[:, :, 0], axis=0)                       # (Cout,)
    ssq = jnp.sum(stats[:, :, 1], axis=0)                        # (Cout,)
    mean = ssum / count
    var = jnp.maximum(ssq / count - mean * mean, 0.0)            # biased var (train mode)
    scale = gamma * jax.lax.rsqrt(var + eps)
    shift = beta - mean * scale
    scale2 = scale.reshape(Cout, 1).astype(jnp.float32)
    shift2 = shift.reshape(Cout, 1).astype(jnp.float32)

    # ---- kernel 2: normalize * gamma + beta, ReLU (tiled, both axes parallel) ----
    out_flat = pl.pallas_call(
        _bn_relu_kernel,
        out_shape=jax.ShapeDtypeStruct((N, S2, Cout, HW), jnp.float32),
        grid_spec=pltpu.PrefetchScalarGridSpec(
            num_scalar_prefetch=0,
            grid=(N, S2),
            in_specs=[pl.BlockSpec((None, None, Cout, HW),
                                   lambda n, ph: (n, ph, 0, 0)),
                      pl.BlockSpec((Cout, 1), lambda n, ph: (0, 0)),
                      pl.BlockSpec((Cout, 1), lambda n, ph: (0, 0))],
            out_specs=pl.BlockSpec((None, None, Cout, HW),
                                   lambda n, ph: (n, ph, 0, 0))),
        compiler_params=pltpu.CompilerParams(
            dimension_semantics=("parallel", "parallel")),
    )(y, scale2, shift2)

    # ---- pixel shuffle back to NCHW: out[n,c,s*a+rh,s*b+rw] = y[n, rh*s+rw, c, a*W+b]
    out = out_flat.reshape(N, s, s, Cout, H, W)
    out = jnp.transpose(out, (0, 3, 4, 1, 5, 2))                 # (N, Cout, H, s, W, s)
    return out.reshape(N, Cout, Ho, Wo)


# -------------------------- pure-JAX reference ------------------------------ #

def _reference(x, weight, bias, gamma, beta, stride, K, p, eps=1e-5):
    w_conv = jnp.transpose(weight, (1, 0, 2, 3))[:, :, ::-1, ::-1]   # (Cout,Cin,K,K)
    y = jax.lax.conv_general_dilated(
        x, w_conv, window_strides=(1, 1),
        padding=[(K - 1 - p, K - 1 - p)] * 2,
        lhs_dilation=(stride, stride),
        dimension_numbers=('NCHW', 'OIHW', 'NCHW'))
    y = y + bias[None, :, None, None]
    mean = jnp.mean(y, axis=(0, 2, 3), keepdims=True)
    var = jnp.mean((y - mean) ** 2, axis=(0, 2, 3), keepdims=True)
    y_hat = (y - mean) * jax.lax.rsqrt(var + eps)
    y_hat = y_hat * gamma[None, :, None, None] + beta[None, :, None, None]
    return jnp.maximum(y_hat, 0.0)


if __name__ == "__main__":
    # GeneratorDecoderBlock(in_channels=4, out_channels=8, stride=2)
    N, Cin, Cout, H, W = 2, 4, 8, 16, 16
    K, stride, pad = 4, 2, 1

    key = jax.random.PRNGKey(0)
    kx, kw, kb = jax.random.split(key, 3)
    x = jax.random.normal(kx, (N, Cin, H, W), jnp.float32)
    weight = 0.1 * jax.random.normal(kw, (Cin, Cout, K, K), jnp.float32)  # ConvTranspose2d layout
    bias = 0.1 * jax.random.normal(kb, (Cout,), jnp.float32)
    gamma = jnp.ones((Cout,), jnp.float32)   # BatchNorm2d default init
    beta = jnp.zeros((Cout,), jnp.float32)

    fwd = jax.jit(functools.partial(generator_decoder_block,
                                    stride=stride, kernel_size=K, padding=pad))
    out = jax.block_until_ready(fwd(x, weight, bias, gamma, beta))

    # Reference in f32 arithmetic, but with the same bf16-rounded conv operands the
    # kernel feeds the MXU, so the comparison isolates kernel correctness.
    xr = x.astype(jnp.bfloat16).astype(jnp.float32)
    wr = weight.astype(jnp.bfloat16).astype(jnp.float32)
    ref = _reference(xr, wr, bias, gamma, beta, stride, K, pad)

    assert out.shape == (N, Cout, stride * H, stride * W), out.shape
    max_err = float(jnp.max(jnp.abs(out - ref)))
    assert jnp.allclose(out, ref, atol=2e-2, rtol=2e-2), max_err

    print("KERNEL_OK")
</pallas_src>

<mosaic_0001>
module attributes {stable_mosaic.version = 11 : i64} {
  func.func @kernel(%arg0: i32, %arg1: memref<1x9x4x256xbf16, #tpu.memory_space<vmem>>, %arg2: memref<16x8x4xbf16, #tpu.memory_space<vmem>>, %arg3: memref<1x4x8x256xbf16, #tpu.memory_space<vmem>>, %arg4: memref<1x8x2xf32, #tpu.memory_space<vmem>>, %arg5: memref<4x8x256xf32, #tpu.memory_space<vmem>>) attributes {dimension_semantics = [#tpu.dimension_semantics<parallel>], iteration_bounds = array<i64: 2>, scalar_prefetch = 0 : i64, scratch_operands = 1 : i64, tpu.core_type = #tpu.core_type<tc>, window_params = [{transform_indices = @transform_0, window_bounds = array<i64: 1, 9, 4, 256>}, {pipeline_mode = #tpu.pipeline_mode<synchronous>, transform_indices = @transform_1, window_bounds = array<i64: 16, 8, 4>}, {transform_indices = @transform_2, window_bounds = array<i64: 1, 4, 8, 256>}, {transform_indices = @transform_3, window_bounds = array<i64: 1, 8, 2>}]} {
    %c0 = arith.constant 0 : index
    %c0_0 = arith.constant 0 : index
    %c0_1 = arith.constant 0 : index
    %0 = vector.load %arg2[%c0, %c0_0, %c0_1] : memref<16x8x4xbf16, #tpu.memory_space<vmem>>, vector<1x8x4xbf16>
    %1 = vector.shape_cast %0 : vector<1x8x4xbf16> to vector<8x4xbf16>
    %c0_2 = arith.constant 0 : index
    %c0_3 = arith.constant 0 : index
    %c0_4 = arith.constant 0 : index
    %c0_5 = arith.constant 0 : index
    %2 = vector.load %arg1[%c0_2, %c0_3, %c0_4, %c0_5] : memref<1x9x4x256xbf16, #tpu.memory_space<vmem>>, vector<1x1x4x256xbf16>
    %3 = vector.shape_cast %2 : vector<1x1x4x256xbf16> to vector<4x256xbf16>
    %cst = arith.constant dense<0.000000e+00> : vector<8x256xf32>
    %4 = tpu.matmul %1, %3, %cst {dimension_numbers = #tpu.dot_dimension_numbers<[1], [0], [0], [1], [0, 0, 1, 1], [], []>} : vector<8x4xbf16>, vector<4x256xbf16>, vector<8x256xf32> -> vector<8x256xf32>
    %c0_6 = arith.constant 0 : index
    %c0_7 = arith.constant 0 : index
    %c0_8 = arith.constant 0 : index
    %5 = vector.load %arg5[%c0_6, %c0_7, %c0_8] : memref<4x8x256xf32, #tpu.memory_space<vmem>>, vector<1x8x256xf32>
    %6 = vector.shape_cast %5 : vector<1x8x256xf32> to vector<8x256xf32>
    %7 = vector.shape_cast %4 : vector<8x256xf32> to vector<1x8x256xf32>
    tpu.vector_store %arg5[%c0_6, %c0_7, %c0_8], %7 {strides = array<i32>} : memref<4x8x256xf32, #tpu.memory_space<vmem>>, vector<1x8x256xf32>,
    %c1 = arith.constant 1 : index
    %c0_9 = arith.constant 0 : index
    %c0_10 = arith.constant 0 : index
    %8 = vector.load %arg2[%c1, %c0_9, %c0_10] : memref<16x8x4xbf16, #tpu.memory_space<vmem>>, vector<1x8x4xbf16>
    %9 = vector.shape_cast %8 : vector<1x8x4xbf16> to vector<8x4xbf16>
    %c0_11 = arith.constant 0 : index
    %c1_12 = arith.constant 1 : index
    %c0_13 = arith.constant 0 : index
    %c0_14 = arith.constant 0 : index
    %10 = vector.load %arg1[%c0_11, %c1_12, %c0_13, %c0_14] : memref<1x9x4x256xbf16, #tpu.memory_space<vmem>>, vector<1x1x4x256xbf16>
    %11 = vector.shape_cast %10 : vector<1x1x4x256xbf16> to vector<4x256xbf16>
    %cst_15 = arith.constant dense<0.000000e+00> : vector<8x256xf32>
    %12 = tpu.matmul %9, %11, %cst_15 {dimension_numbers = #tpu.dot_dimension_numbers<[1], [0], [0], [1], [0, 0, 1, 1], [], []>} : vector<8x4xbf16>, vector<4x256xbf16>, vector<8x256xf32> -> vector<8x256xf32>
    %c0_16 = arith.constant 0 : index
    %c0_17 = arith.constant 0 : index
    %c0_18 = arith.constant 0 : index
    %13 = vector.load %arg5[%c0_16, %c0_17, %c0_18] : memref<4x8x256xf32, #tpu.memory_space<vmem>>, vector<1x8x256xf32>
    %14 = vector.shape_cast %13 : vector<1x8x256xf32> to vector<8x256xf32>
    %15 = arith.addf %14, %12 : vector<8x256xf32>
    %c0_19 = arith.constant 0 : index
    %c0_20 = arith.constant 0 : index
    %c0_21 = arith.constant 0 : index
    %16 = vector.load %arg5[%c0_19, %c0_20, %c0_21] : memref<4x8x256xf32, #tpu.memory_space<vmem>>, vector<1x8x256xf32>
    %17 = vector.shape_cast %16 : vector<1x8x256xf32> to vector<8x256xf32>
    %18 = vector.shape_cast %15 : vector<8x256xf32> to vector<1x8x256xf32>
    tpu.vector_store %arg5[%c0_19, %c0_20, %c0_21], %18 {strides = array<i32>} : memref<4x8x256xf32, #tpu.memory_space<vmem>>, vector<1x8x256xf32>,
    %c2 = arith.constant 2 : index
    %c0_22 = arith.constant 0 : index
    %c0_23 = arith.constant 0 : index
    %19 = vector.load %arg2[%c2, %c0_22, %c0_23] : memref<16x8x4xbf16, #tpu.memory_space<vmem>>, vector<1x8x4xbf16>
    %20 = vector.shape_cast %19 : vector<1x8x4xbf16> to vector<8x4xbf16>
    %c0_24 = arith.constant 0 : index
    %c2_25 = arith.constant 2 : index
    %c0_26 = arith.constant 0 : index
    %c0_27 = arith.constant 0 : index
    %21 = vector.load %arg1[%c0_24, %c2_25, %c0_26, %c0_27] : memref<1x9x4x256xbf16, #tpu.memory_space<vmem>>, vector<1x1x4x256xbf16>
    %22 = vector.shape_cast %21 : vector<1x1x4x256xbf16> to vector<4x256xbf16>
    %cst_28 = arith.constant dense<0.000000e+00> : vector<8x256xf32>
    %23 = tpu.matmul %20, %22, %cst_28 {dimension_numbers = #tpu.dot_dimension_numbers<[1], [0], [0], [1], [0, 0, 1, 1], [], []>} : vector<8x4xbf16>, vector<4x256xbf16>, vector<8x256xf32> -> vector<8x256xf32>
    %c0_29 = arith.constant 0 : index
    %c0_30 = arith.constant 0 : index
    %c0_31 = arith.constant 0 : index
    %24 = vector.load %arg5[%c0_29, %c0_30, %c0_31] : memref<4x8x256xf32, #tpu.memory_space<vmem>>, vector<1x8x256xf32>
    %25 = vector.shape_cast %24 : vector<1x8x256xf32> to vector<8x256xf32>
    %26 = arith.addf %25, %23 : vector<8x256xf32>
    %c0_32 = arith.constant 0 : index
    %c0_33 = arith.constant 0 : index
    %c0_34 = arith.constant 0 : index
    %27 = vector.load %arg5[%c0_32, %c0_33, %c0_34] : memref<4x8x256xf32, #tpu.memory_space<vmem>>, vector<1x8x256xf32>
    %28 = vector.shape_cast %27 : vector<1x8x256xf32> to vector<8x256xf32>
    %29 = vector.shape_cast %26 : vector<8x256xf32> to vector<1x8x256xf32>
    tpu.vector_store %arg5[%c0_32, %c0_33, %c0_34], %29 {strides = array<i32>} : memref<4x8x256xf32, #tpu.memory_space<vmem>>, vector<1x8x256xf32>,
    %c3 = arith.constant 3 : index
    %c0_35 = arith.constant 0 : index
    %c0_36 = arith.constant 0 : index
    %30 = vector.load %arg2[%c3, %c0_35, %c0_36] : memref<16x8x4xbf16, #tpu.memory_space<vmem>>, vector<1x8x4xbf16>
    %31 = vector.shape_cast %30 : vector<1x8x4xbf16> to vector<8x4xbf16>
    %c0_37 = arith.constant 0 : index
    %c3_38 = arith.constant 3 : index
    %c0_39 = arith.constant 0 : index
    %c0_40 = arith.constant 0 : index
    %32 = vector.load %arg1[%c0_37, %c3_38, %c0_39, %c0_40] : memref<1x9x4x256xbf16, #tpu.memory_space<vmem>>, vector<1x1x4x256xbf16>
    %33 = vector.shape_cast %32 : vector<1x1x4x256xbf16> to vector<4x256xbf16>
    %cst_41 = arith.constant dense<0.000000e+00> : vector<8x256xf32>
    %34 = tpu.matmul %31, %33, %cst_41 {dimension_numbers = #tpu.dot_dimension_numbers<[1], [0], [0], [1], [0, 0, 1, 1], [], []>} : vector<8x4xbf16>, vector<4x256xbf16>, vector<8x256xf32> -> vector<8x256xf32>
    %c0_42 = arith.constant 0 : index
    %c0_43 = arith.constant 0 : index
    %c0_44 = arith.constant 0 : index
    %35 = vector.load %arg5[%c0_42, %c0_43, %c0_44] : memref<4x8x256xf32, #tpu.memory_space<vmem>>, vector<1x8x256xf32>
    %36 = vector.shape_cast %35 : vector<1x8x256xf32> to vector<8x256xf32>
    %37 = arith.addf %36, %34 : vector<8x256xf32>
    %c0_45 = arith.constant 0 : index
    %c0_46 = arith.constant 0 : index
    %c0_47 = arith.constant 0 : index
    %38 = vector.load %arg5[%c0_45, %c0_46, %c0_47] : memref<4x8x256xf32, #tpu.memory_space<vmem>>, vector<1x8x256xf32>
    %39 = vector.shape_cast %38 : vector<1x8x256xf32> to vector<8x256xf32>
    %40 = vector.shape_cast %37 : vector<8x256xf32> to vector<1x8x256xf32>
    tpu.vector_store %arg5[%c0_45, %c0_46, %c0_47], %40 {strides = array<i32>} : memref<4x8x256xf32, #tpu.memory_space<vmem>>, vector<1x8x256xf32>,
    %c4 = arith.constant 4 : index
    %c0_48 = arith.constant 0 : index
    %c0_49 = arith.constant 0 : index
    %41 = vector.load %arg2[%c4, %c0_48, %c0_49] : memref<16x8x4xbf16, #tpu.memory_space<vmem>>, vector<1x8x4xbf16>
    %42 = vector.shape_cast %41 : vector<1x8x4xbf16> to vector<8x4xbf16>
    %c0_50 = arith.constant 0 : index
    %c4_51 = arith.constant 4 : index
    %c0_52 = arith.constant 0 : index
    %c0_53 = arith.constant 0 : index
    %43 = vector.load %arg1[%c0_50, %c4_51, %c0_52, %c0_53] : memref<1x9x4x256xbf16, #tpu.memory_space<vmem>>, vector<1x1x4x256xbf16>
    %44 = vector.shape_cast %43 : vector<1x1x4x256xbf16> to vector<4x256xbf16>
    %cst_54 = arith.constant dense<0.000000e+00> : vector<8x256xf32>
    %45 = tpu.matmul %42, %44, %cst_54 {dimension_numbers = #tpu.dot_dimension_numbers<[1], [0], [0], [1], [0, 0, 1, 1], [], []>} : vector<8x4xbf16>, vector<4x256xbf16>, vector<8x256xf32> -> vector<8x256xf32>
    %c1_55 = arith.constant 1 : index
    %c0_56 = arith.constant 0 : index
    %c0_57 = arith.constant 0 : index
    %46 = vector.load %arg5[%c1_55, %c0_56, %c0_57] : memref<4x8x256xf32, #tpu.memory_space<vmem>>, vector<1x8x256xf32>
    %47 = vector.shape_cast %46 : vector<1x8x256xf32> to vector<8x256xf32>
    %48 = vector.shape_cast %45 : vector<8x256xf32> to vector<1x8x256xf32>
    tpu.vector_store %arg5[%c1_55, %c0_56, %c0_57], %48 {strides = array<i32>} : memref<4x8x256xf32, #tpu.memory_space<vmem>>, vector<1x8x256xf32>,
    %c5 = arith.constant 5 : index
    %c0_58 = arith.constant 0 : index
    %c0_59 = arith.constant 0 : index
    %49 = vector.load %arg2[%c5, %c0_58, %c0_59] : memref<16x8x4xbf16, #tpu.memory_space<vmem>>, vector<1x8x4xbf16>
    %50 = vector.shape_cast %49 : vector<1x8x4xbf16> to vector<8x4xbf16>
    %c0_60 = arith.constant 0 : index
    %c0_61 = arith.constant 0 : index
    %c0_62 = arith.constant 0 : index
    %c0_63 = arith.constant 0 : index
    %51 = vector.load %arg1[%c0_60, %c0_61, %c0_62, %c0_63] : memref<1x9x4x256xbf16, #tpu.memory_space<vmem>>, vector<1x1x4x256xbf16>
    %52 = vector.shape_cast %51 : vector<1x1x4x256xbf16> to vector<4x256xbf16>
    %cst_64 = arith.constant dense<0.000000e+00> : vector<8x256xf32>
    %53 = tpu.matmul %50, %52, %cst_64 {dimension_numbers = #tpu.dot_dimension_numbers<[1], [0], [0], [1], [0, 0, 1, 1], [], []>} : vector<8x4xbf16>, vector<4x256xbf16>, vector<8x256xf32> -> vector<8x256xf32>
    %c1_65 = arith.constant 1 : index
    %c0_66 = arith.constant 0 : index
    %c0_67 = arith.constant 0 : index
    %54 = vector.load %arg5[%c1_65, %c0_66, %c0_67] : memref<4x8x256xf32, #tpu.memory_space<vmem>>, vector<1x8x256xf32>
    %55 = vector.shape_cast %54 : vector<1x8x256xf32> to vector<8x256xf32>
    %56 = arith.addf %55, %53 : vector<8x256xf32>
    %c1_68 = arith.constant 1 : index
    %c0_69 = arith.constant 0 : index
    %c0_70 = arith.constant 0 : index
    %57 = vector.load %arg5[%c1_68, %c0_69, %c0_70] : memref<4x8x256xf32, #tpu.memory_space<vmem>>, vector<1x8x256xf32>
    %58 = vector.shape_cast %57 : vector<1x8x256xf32> to vector<8x256xf32>
    %59 = vector.shape_cast %56 : vector<8x256xf32> to vector<1x8x256xf32>
    tpu.vector_store %arg5[%c1_68, %c0_69, %c0_70], %59 {strides = array<i32>} : memref<4x8x256xf32, #tpu.memory_space<vmem>>, vector<1x8x256xf32>,
    %c6 = arith.constant 6 : index
    %c0_71 = arith.constant 0 : index
    %c0_72 = arith.constant 0 : index
    %60 = vector.load %arg2[%c6, %c0_71, %c0_72] : memref<16x8x4xbf16, #tpu.memory_space<vmem>>, vector<1x8x4xbf16>
    %61 = vector.shape_cast %60 : vector<1x8x4xbf16> to vector<8x4xbf16>
    %c0_73 = arith.constant 0 : index
    %c5_74 = arith.constant 5 : index
    %c0_75 = arith.constant 0 : index
    %c0_76 = arith.constant 0 : index
    %62 = vector.load %arg1[%c0_73, %c5_74, %c0_75, %c0_76] : memref<1x9x4x256xbf16, #tpu.memory_space<vmem>>, vector<1x1x4x256xbf16>
    %63 = vector.shape_cast %62 : vector<1x1x4x256xbf16> to vector<4x256xbf16>
    %cst_77 = arith.constant dense<0.000000e+00> : vector<8x256xf32>
    %64 = tpu.matmul %61, %63, %cst_77 {dimension_numbers = #tpu.dot_dimension_numbers<[1], [0], [0], [1], [0, 0, 1, 1], [], []>} : vector<8x4xbf16>, vector<4x256xbf16>, vector<8x256xf32> -> vector<8x256xf32>
    %c1_78 = arith.constant 1 : index
    %c0_79 = arith.constant 0 : index
    %c0_80 = arith.constant 0 : index
    %65 = vector.load %arg5[%c1_78, %c0_79, %c0_80] : memref<4x8x256xf32, #tpu.memory_space<vmem>>, vector<1x8x256xf32>
    %66 = vector.shape_cast %65 : vector<1x8x256xf32> to vector<8x256xf32>
    %67 = arith.addf %66, %64 : vector<8x256xf32>
    %c1_81 = arith.constant 1 : index
    %c0_82 = arith.constant 0 : index
    %c0_83 = arith.constant 0 : index
    %68 = vector.load %arg5[%c1_81, %c0_82, %c0_83] : memref<4x8x256xf32, #tpu.memory_space<vmem>>, vector<1x8x256xf32>
    %69 = vector.shape_cast %68 : vector<1x8x256xf32> to vector<8x256xf32>
    %70 = vector.shape_cast %67 : vector<8x256xf32> to vector<1x8x256xf32>
    tpu.vector_store %arg5[%c1_81, %c0_82, %c0_83], %70 {strides = array<i32>} : memref<4x8x256xf32, #tpu.memory_space<vmem>>, vector<1x8x256xf32>,
    %c7 = arith.constant 7 : index
    %c0_84 = arith.constant 0 : index
    %c0_85 = arith.constant 0 : index
    %71 = vector.load %arg2[%c7, %c0_84, %c0_85] : memref<16x8x4xbf16, #tpu.memory_space<vmem>>, vector<1x8x4xbf16>
    %72 = vector.shape_cast %71 : vector<1x8x4xbf16> to vector<8x4xbf16>
    %c0_86 = arith.constant 0 : index
    %c2_87 = arith.constant 2 : index
    %c0_88 = arith.constant 0 : index
    %c0_89 = arith.constant 0 : index
    %73 = vector.load %arg1[%c0_86, %c2_87, %c0_88, %c0_89] : memref<1x9x4x256xbf16, #tpu.memory_space<vmem>>, vector<1x1x4x256xbf16>
    %74 = vector.shape_cast %73 : vector<1x1x4x256xbf16> to vector<4x256xbf16>
    %cst_90 = arith.constant dense<0.000000e+00> : vector<8x256xf32>
    %75 = tpu.matmul %72, %74, %cst_90 {dimension_numbers = #tpu.dot_dimension_numbers<[1], [0], [0], [1], [0, 0, 1, 1], [], []>} : vector<8x4xbf16>, vector<4x256xbf16>, vector<8x256xf32> -> vector<8x256xf32>
    %c1_91 = arith.constant 1 : index
    %c0_92 = arith.constant 0 : index
    %c0_93 = arith.constant 0 : index
    %76 = vector.load %arg5[%c1_91, %c0_92, %c0_93] : memref<4x8x256xf32, #tpu.memory_space<vmem>>, vector<1x8x256xf32>
    %77 = vector.shape_cast %76 : vector<1x8x256xf32> to vector<8x256xf32>
    %78 = arith.addf %77, %75 : vector<8x256xf32>
    %c1_94 = arith.constant 1 : index
    %c0_95 = arith.constant 0 : index
    %c0_96 = arith.constant 0 : index
    %79 = vector.load %arg5[%c1_94, %c0_95, %c0_96] : memref<4x8x256xf32, #tpu.memory_space<vmem>>, vector<1x8x256xf32>
    %80 = vector.shape_cast %79 : vector<1x8x256xf32> to vector<8x256xf32>
    %81 = vector.shape_cast %78 : vector<8x256xf32> to vector<1x8x256xf32>
    tpu.vector_store %arg5[%c1_94, %c0_95, %c0_96], %81 {strides = array<i32>} : memref<4x8x256xf32, #tpu.memory_space<vmem>>, vector<1x8x256xf32>,
    %c8 = arith.constant 8 : index
    %c0_97 = arith.constant 0 : index
    %c0_98 = arith.constant 0 : index
    %82 = vector.load %arg2[%c8, %c0_97, %c0_98] : memref<16x8x4xbf16, #tpu.memory_space<vmem>>, vector<1x8x4xbf16>
    %83 = vector.shape_cast %82 : vector<1x8x4xbf16> to vector<8x4xbf16>
    %c0_99 = arith.constant 0 : index
    %c6_100 = arith.constant 6 : index
    %c0_101 = arith.constant 0 : index
    %c0_102 = arith.constant 0 : index
    %84 = vector.load %arg1[%c0_99, %c6_100, %c0_101, %c0_102] : memref<1x9x4x256xbf16, #tpu.memory_space<vmem>>, vector<1x1x4x256xbf16>
    %85 = vector.shape_cast %84 : vector<1x1x4x256xbf16> to vector<4x256xbf16>
    %cst_103 = arith.constant dense<0.000000e+00> : vector<8x256xf32>
    %86 = tpu.matmul %83, %85, %cst_103 {dimension_numbers = #tpu.dot_dimension_numbers<[1], [0], [0], [1], [0, 0, 1, 1], [], []>} : vector<8x4xbf16>, vector<4x256xbf16>, vector<8x256xf32> -> vector<8x256xf32>
    %c2_104 = arith.constant 2 : index
    %c0_105 = arith.constant 0 : index
    %c0_106 = arith.constant 0 : index
    %87 = vector.load %arg5[%c2_104, %c0_105, %c0_106] : memref<4x8x256xf32, #tpu.memory_space<vmem>>, vector<1x8x256xf32>
    %88 = vector.shape_cast %87 : vector<1x8x256xf32> to vector<8x256xf32>
    %89 = vector.shape_cast %86 : vector<8x256xf32> to vector<1x8x256xf32>
    tpu.vector_store %arg5[%c2_104, %c0_105, %c0_106], %89 {strides = array<i32>} : memref<4x8x256xf32, #tpu.memory_space<vmem>>, vector<1x8x256xf32>,
    %c9 = arith.constant 9 : index
    %c0_107 = arith.constant 0 : index
    %c0_108 = arith.constant 0 : index
    %90 = vector.load %arg2[%c9, %c0_107, %c0_108] : memref<16x8x4xbf16, #tpu.memory_space<vmem>>, vector<1x8x4xbf16>
    %91 = vector.shape_cast %90 : vector<1x8x4xbf16> to vector<8x4xbf16>
    %c0_109 = arith.constant 0 : index
    %c7_110 = arith.constant 7 : index
    %c0_111 = arith.constant 0 : index
    %c0_112 = arith.constant 0 : index
    %92 = vector.load %arg1[%c0_109, %c7_110, %c0_111, %c0_112] : memref<1x9x4x256xbf16, #tpu.memory_space<vmem>>, vector<1x1x4x256xbf16>
    %93 = vector.shape_cast %92 : vector<1x1x4x256xbf16> to vector<4x256xbf16>
    %cst_113 = arith.constant dense<0.000000e+00> : vector<8x256xf32>
    %94 = tpu.matmul %91, %93, %cst_113 {dimension_numbers = #tpu.dot_dimension_numbers<[1], [0], [0], [1], [0, 0, 1, 1], [], []>} : vector<8x4xbf16>, vector<4x256xbf16>, vector<8x256xf32> -> vector<8x256xf32>
    %c2_114 = arith.constant 2 : index
    %c0_115 = arith.constant 0 : index
    %c0_116 = arith.constant 0 : index
    %95 = vector.load %arg5[%c2_114, %c0_115, %c0_116] : memref<4x8x256xf32, #tpu.memory_space<vmem>>, vector<1x8x256xf32>
    %96 = vector.shape_cast %95 : vector<1x8x256xf32> to vector<8x256xf32>
    %97 = arith.addf %96, %94 : vector<8x256xf32>
    %c2_117 = arith.constant 2 : index
    %c0_118 = arith.constant 0 : index
    %c0_119 = arith.constant 0 : index
    %98 = vector.load %arg5[%c2_117, %c0_118, %c0_119] : memref<4x8x256xf32, #tpu.memory_space<vmem>>, vector<1x8x256xf32>
    %99 = vector.shape_cast %98 : vector<1x8x256xf32> to vector<8x256xf32>
    %100 = vector.shape_cast %97 : vector<8x256xf32> to vector<1x8x256xf32>
    tpu.vector_store %arg5[%c2_117, %c0_118, %c0_119], %100 {strides = array<i32>} : memref<4x8x256xf32, #tpu.memory_space<vmem>>, vector<1x8x256xf32>,
    %c10 = arith.constant 10 : index
    %c0_120 = arith.constant 0 : index
    %c0_121 = arith.constant 0 : index
    %101 = vector.load %arg2[%c10, %c0_120, %c0_121] : memref<16x8x4xbf16, #tpu.memory_space<vmem>>, vector<1x8x4xbf16>
    %102 = vector.shape_cast %101 : vector<1x8x4xbf16> to vector<8x4xbf16>
    %c0_122 = arith.constant 0 : index
    %c0_123 = arith.constant 0 : index
    %c0_124 = arith.constant 0 : index
    %c0_125 = arith.constant 0 : index
    %103 = vector.load %arg1[%c0_122, %c0_123, %c0_124, %c0_125] : memref<1x9x4x256xbf16, #tpu.memory_space<vmem>>, vector<1x1x4x256xbf16>
    %104 = vector.shape_cast %103 : vector<1x1x4x256xbf16> to vector<4x256xbf16>
    %cst_126 = arith.constant dense<0.000000e+00> : vector<8x256xf32>
    %105 = tpu.matmul %102, %104, %cst_126 {dimension_numbers = #tpu.dot_dimension_numbers<[1], [0], [0], [1], [0, 0, 1, 1], [], []>} : vector<8x4xbf16>, vector<4x256xbf16>, vector<8x256xf32> -> vector<8x256xf32>
    %c2_127 = arith.constant 2 : index
    %c0_128 = arith.constant 0 : index
    %c0_129 = arith.constant 0 : index
    %106 = vector.load %arg5[%c2_127, %c0_128, %c0_129] : memref<4x8x256xf32, #tpu.memory_space<vmem>>, vector<1x8x256xf32>
    %107 = vector.shape_cast %106 : vector<1x8x256xf32> to vector<8x256xf32>
    %108 = arith.addf %107, %105 : vector<8x256xf32>
    %c2_130 = arith.constant 2 : index
    %c0_131 = arith.constant 0 : index
    %c0_132 = arith.constant 0 : index
    %109 = vector.load %arg5[%c2_130, %c0_131, %c0_132] : memref<4x8x256xf32, #tpu.memory_space<vmem>>, vector<1x8x256xf32>
    %110 = vector.shape_cast %109 : vector<1x8x256xf32> to vector<8x256xf32>
    %111 = vector.shape_cast %108 : vector<8x256xf32> to vector<1x8x256xf32>
    tpu.vector_store %arg5[%c2_130, %c0_131, %c0_132], %111 {strides = array<i32>} : memref<4x8x256xf32, #tpu.memory_space<vmem>>, vector<1x8x256xf32>,
    %c11 = arith.constant 11 : index
    %c0_133 = arith.constant 0 : index
    %c0_134 = arith.constant 0 : index
    %112 = vector.load %arg2[%c11, %c0_133, %c0_134] : memref<16x8x4xbf16, #tpu.memory_space<vmem>>, vector<1x8x4xbf16>
    %113 = vector.shape_cast %112 : vector<1x8x4xbf16> to vector<8x4xbf16>
    %c0_135 = arith.constant 0 : index
    %c1_136 = arith.constant 1 : index
    %c0_137 = arith.constant 0 : index
    %c0_138 = arith.constant 0 : index
    %114 = vector.load %arg1[%c0_135, %c1_136, %c0_137, %c0_138] : memref<1x9x4x256xbf16, #tpu.memory_space<vmem>>, vector<1x1x4x256xbf16>
    %115 = vector.shape_cast %114 : vector<1x1x4x256xbf16> to vector<4x256xbf16>
    %cst_139 = arith.constant dense<0.000000e+00> : vector<8x256xf32>
    %116 = tpu.matmul %113, %115, %cst_139 {dimension_numbers = #tpu.dot_dimension_numbers<[1], [0], [0], [1], [0, 0, 1, 1], [], []>} : vector<8x4xbf16>, vector<4x256xbf16>, vector<8x256xf32> -> vector<8x256xf32>
    %c2_140 = arith.constant 2 : index
    %c0_141 = arith.constant 0 : index
    %c0_142 = arith.constant 0 : index
    %117 = vector.load %arg5[%c2_140, %c0_141, %c0_142] : memref<4x8x256xf32, #tpu.memory_space<vmem>>, vector<1x8x256xf32>
    %118 = vector.shape_cast %117 : vector<1x8x256xf32> to vector<8x256xf32>
    %119 = arith.addf %118, %116 : vector<8x256xf32>
    %c2_143 = arith.constant 2 : index
    %c0_144 = arith.constant 0 : index
    %c0_145 = arith.constant 0 : index
    %120 = vector.load %arg5[%c2_143, %c0_144, %c0_145] : memref<4x8x256xf32, #tpu.memory_space<vmem>>, vector<1x8x256xf32>
    %121 = vector.shape_cast %120 : vector<1x8x256xf32> to vector<8x256xf32>
    %122 = vector.shape_cast %119 : vector<8x256xf32> to vector<1x8x256xf32>
    tpu.vector_store %arg5[%c2_143, %c0_144, %c0_145], %122 {strides = array<i32>} : memref<4x8x256xf32, #tpu.memory_space<vmem>>, vector<1x8x256xf32>,
    %c12 = arith.constant 12 : index
    %c0_146 = arith.constant 0 : index
    %c0_147 = arith.constant 0 : index
    %123 = vector.load %arg2[%c12, %c0_146, %c0_147] : memref<16x8x4xbf16, #tpu.memory_space<vmem>>, vector<1x8x4xbf16>
    %124 = vector.shape_cast %123 : vector<1x8x4xbf16> to vector<8x4xbf16>
    %c0_148 = arith.constant 0 : index
    %c8_149 = arith.constant 8 : index
    %c0_150 = arith.constant 0 : index
    %c0_151 = arith.constant 0 : index
    %125 = vector.load %arg1[%c0_148, %c8_149, %c0_150, %c0_151] : memref<1x9x4x256xbf16, #tpu.memory_space<vmem>>, vector<1x1x4x256xbf16>
    %126 = vector.shape_cast %125 : vector<1x1x4x256xbf16> to vector<4x256xbf16>
    %cst_152 = arith.constant dense<0.000000e+00> : vector<8x256xf32>
    %127 = tpu.matmul %124, %126, %cst_152 {dimension_numbers = #tpu.dot_dimension_numbers<[1], [0], [0], [1], [0, 0, 1, 1], [], []>} : vector<8x4xbf16>, vector<4x256xbf16>, vector<8x256xf32> -> vector<8x256xf32>
    %c3_153 = arith.constant 3 : index
    %c0_154 = arith.constant 0 : index
    %c0_155 = arith.constant 0 : index
    %128 = vector.load %arg5[%c3_153, %c0_154, %c0_155] : memref<4x8x256xf32, #tpu.memory_space<vmem>>, vector<1x8x256xf32>
    %129 = vector.shape_cast %128 : vector<1x8x256xf32> to vector<8x256xf32>
    %130 = vector.shape_cast %127 : vector<8x256xf32> to vector<1x8x256xf32>
    tpu.vector_store %arg5[%c3_153, %c0_154, %c0_155], %130 {strides = array<i32>} : memref<4x8x256xf32, #tpu.memory_space<vmem>>, vector<1x8x256xf32>,
    %c13 = arith.constant 13 : index
    %c0_156 = arith.constant 0 : index
    %c0_157 = arith.constant 0 : index
    %131 = vector.load %arg2[%c13, %c0_156, %c0_157] : memref<16x8x4xbf16, #tpu.memory_space<vmem>>, vector<1x8x4xbf16>
    %132 = vector.shape_cast %131 : vector<1x8x4xbf16> to vector<8x4xbf16>
    %c0_158 = arith.constant 0 : index
    %c6_159 = arith.constant 6 : index
    %c0_160 = arith.constant 0 : index
    %c0_161 = arith.constant 0 : index
    %133 = vector.load %arg1[%c0_158, %c6_159, %c0_160, %c0_161] : memref<1x9x4x256xbf16, #tpu.memory_space<vmem>>, vector<1x1x4x256xbf16>
    %134 = vector.shape_cast %133 : vector<1x1x4x256xbf16> to vector<4x256xbf16>
    %cst_162 = arith.constant dense<0.000000e+00> : vector<8x256xf32>
    %135 = tpu.matmul %132, %134, %cst_162 {dimension_numbers = #tpu.dot_dimension_numbers<[1], [0], [0], [1], [0, 0, 1, 1], [], []>} : vector<8x4xbf16>, vector<4x256xbf16>, vector<8x256xf32> -> vector<8x256xf32>
    %c3_163 = arith.constant 3 : index
    %c0_164 = arith.constant 0 : index
    %c0_165 = arith.constant 0 : index
    %136 = vector.load %arg5[%c3_163, %c0_164, %c0_165] : memref<4x8x256xf32, #tpu.memory_space<vmem>>, vector<1x8x256xf32>
    %137 = vector.shape_cast %136 : vector<1x8x256xf32> to vector<8x256xf32>
    %138 = arith.addf %137, %135 : vector<8x256xf32>
    %c3_166 = arith.constant 3 : index
    %c0_167 = arith.constant 0 : index
    %c0_168 = arith.constant 0 : index
    %139 = vector.load %arg5[%c3_166, %c0_167, %c0_168] : memref<4x8x256xf32, #tpu.memory_space<vmem>>, vector<1x8x256xf32>
    %140 = vector.shape_cast %139 : vector<1x8x256xf32> to vector<8x256xf32>
    %141 = vector.shape_cast %138 : vector<8x256xf32> to vector<1x8x256xf32>
    tpu.vector_store %arg5[%c3_166, %c0_167, %c0_168], %141 {strides = array<i32>} : memref<4x8x256xf32, #tpu.memory_space<vmem>>, vector<1x8x256xf32>,
    %c14 = arith.constant 14 : index
    %c0_169 = arith.constant 0 : index
    %c0_170 = arith.constant 0 : index
    %142 = vector.load %arg2[%c14, %c0_169, %c0_170] : memref<16x8x4xbf16, #tpu.memory_space<vmem>>, vector<1x8x4xbf16>
    %143 = vector.shape_cast %142 : vector<1x8x4xbf16> to vector<8x4xbf16>
    %c0_171 = arith.constant 0 : index
    %c4_172 = arith.constant 4 : index
    %c0_173 = arith.constant 0 : index
    %c0_174 = arith.constant 0 : index
    %144 = vector.load %arg1[%c0_171, %c4_172, %c0_173, %c0_174] : memref<1x9x4x256xbf16, #tpu.memory_space<vmem>>, vector<1x1x4x256xbf16>
    %145 = vector.shape_cast %144 : vector<1x1x4x256xbf16> to vector<4x256xbf16>
    %cst_175 = arith.constant dense<0.000000e+00> : vector<8x256xf32>
    %146 = tpu.matmul %143, %145, %cst_175 {dimension_numbers = #tpu.dot_dimension_numbers<[1], [0], [0], [1], [0, 0, 1, 1], [], []>} : vector<8x4xbf16>, vector<4x256xbf16>, vector<8x256xf32> -> vector<8x256xf32>
    %c3_176 = arith.constant 3 : index
    %c0_177 = arith.constant 0 : index
    %c0_178 = arith.constant 0 : index
    %147 = vector.load %arg5[%c3_176, %c0_177, %c0_178] : memref<4x8x256xf32, #tpu.memory_space<vmem>>, vector<1x8x256xf32>
    %148 = vector.shape_cast %147 : vector<1x8x256xf32> to vector<8x256xf32>
    %149 = arith.addf %148, %146 : vector<8x256xf32>
    %c3_179 = arith.constant 3 : index
    %c0_180 = arith.constant 0 : index
    %c0_181 = arith.constant 0 : index
    %150 = vector.load %arg5[%c3_179, %c0_180, %c0_181] : memref<4x8x256xf32, #tpu.memory_space<vmem>>, vector<1x8x256xf32>
    %151 = vector.shape_cast %150 : vector<1x8x256xf32> to vector<8x256xf32>
    %152 = vector.shape_cast %149 : vector<8x256xf32> to vector<1x8x256xf32>
    tpu.vector_store %arg5[%c3_179, %c0_180, %c0_181], %152 {strides = array<i32>} : memref<4x8x256xf32, #tpu.memory_space<vmem>>, vector<1x8x256xf32>,
    %c15 = arith.constant 15 : index
    %c0_182 = arith.constant 0 : index
    %c0_183 = arith.constant 0 : index
    %153 = vector.load %arg2[%c15, %c0_182, %c0_183] : memref<16x8x4xbf16, #tpu.memory_space<vmem>>, vector<1x8x4xbf16>
    %154 = vector.shape_cast %153 : vector<1x8x4xbf16> to vector<8x4xbf16>
    %c0_184 = arith.constant 0 : index
    %c0_185 = arith.constant 0 : index
    %c0_186 = arith.constant 0 : index
    %c0_187 = arith.constant 0 : index
    %155 = vector.load %arg1[%c0_184, %c0_185, %c0_186, %c0_187] : memref<1x9x4x256xbf16, #tpu.memory_space<vmem>>, vector<1x1x4x256xbf16>
    %156 = vector.shape_cast %155 : vector<1x1x4x256xbf16> to vector<4x256xbf16>
    %cst_188 = arith.constant dense<0.000000e+00> : vector<8x256xf32>
    %157 = tpu.matmul %154, %156, %cst_188 {dimension_numbers = #tpu.dot_dimension_numbers<[1], [0], [0], [1], [0, 0, 1, 1], [], []>} : vector<8x4xbf16>, vector<4x256xbf16>, vector<8x256xf32> -> vector<8x256xf32>
    %c3_189 = arith.constant 3 : index
    %c0_190 = arith.constant 0 : index
    %c0_191 = arith.constant 0 : index
    %158 = vector.load %arg5[%c3_189, %c0_190, %c0_191] : memref<4x8x256xf32, #tpu.memory_space<vmem>>, vector<1x8x256xf32>
    %159 = vector.shape_cast %158 : vector<1x8x256xf32> to vector<8x256xf32>
    %160 = arith.addf %159, %157 : vector<8x256xf32>
    %c3_192 = arith.constant 3 : index
    %c0_193 = arith.constant 0 : index
    %c0_194 = arith.constant 0 : index
    %161 = vector.load %arg5[%c3_192, %c0_193, %c0_194] : memref<4x8x256xf32, #tpu.memory_space<vmem>>, vector<1x8x256xf32>
    %162 = vector.shape_cast %161 : vector<1x8x256xf32> to vector<8x256xf32>
    %163 = vector.shape_cast %160 : vector<8x256xf32> to vector<1x8x256xf32>
    tpu.vector_store %arg5[%c3_192, %c0_193, %c0_194], %163 {strides = array<i32>} : memref<4x8x256xf32, #tpu.memory_space<vmem>>, vector<1x8x256xf32>,
    %c0_195 = arith.constant 0 : index
    %c0_196 = arith.constant 0 : index
    %c0_197 = arith.constant 0 : index
    %164 = vector.load %arg5[%c0_195, %c0_196, %c0_197] : memref<4x8x256xf32, #tpu.memory_space<vmem>>, vector<4x8x256xf32>
    %165 = arith.truncf %164 : vector<4x8x256xf32> to vector<4x8x256xbf16>
    %c0_198 = arith.constant 0 : index
    %c0_199 = arith.constant 0 : index
    %c0_200 = arith.constant 0 : index
    %c0_201 = arith.constant 0 : index
    %166 = vector.load %arg3[%c0_198, %c0_199, %c0_200, %c0_201] : memref<1x4x8x256xbf16, #tpu.memory_space<vmem>>, vector<1x4x8x256xbf16>
    %167 = vector.shape_cast %166 : vector<1x4x8x256xbf16> to vector<4x8x256xbf16>
    %168 = vector.shape_cast %165 : vector<4x8x256xbf16> to vector<1x4x8x256xbf16>
    tpu.vector_store %arg3[%c0_198, %c0_199, %c0_200, %c0_201], %168 {strides = array<i32>} : memref<1x4x8x256xbf16, #tpu.memory_space<vmem>>, vector<1x4x8x256xbf16>,
    %cst_202 = arith.constant dense<0.000000e+00> : vector<8x256xf32>
    %169 = vector.multi_reduction <add>, %164, %cst_202 [0] : vector<4x8x256xf32> to vector<8x256xf32>
    %170 = arith.mulf %164, %164 : vector<4x8x256xf32>
    %cst_203 = arith.constant dense<0.000000e+00> : vector<8x256xf32>
    %171 = vector.multi_reduction <add>, %170, %cst_203 [0] : vector<4x8x256xf32> to vector<8x256xf32>
    %cst_204 = arith.constant dense<0.000000e+00> : vector<8xf32>
    %172 = vector.multi_reduction <add>, %169, %cst_204 [1] : vector<8x256xf32> to vector<8xf32>
    %173 = vector.shape_cast %172 : vector<8xf32> to vector<8x1xf32>
    %c0_205 = arith.constant 0 : index
    %c0_206 = arith.constant 0 : index
    %c0_207 = arith.constant 0 : index
    %174 = vector.load %arg4[%c0_205, %c0_206, %c0_207] : memref<1x8x2xf32, #tpu.memory_space<vmem>>, vector<1x8x1xf32>
    %175 = vector.shape_cast %174 : vector<1x8x1xf32> to vector<8x1xf32>
    %176 = vector.shape_cast %173 : vector<8x1xf32> to vector<1x8x1xf32>
    tpu.vector_store %arg4[%c0_205, %c0_206, %c0_207], %176 {strides = array<i32>} : memref<1x8x2xf32, #tpu.memory_space<vmem>>, vector<1x8x1xf32>,
    %cst_208 = arith.constant dense<0.000000e+00> : vector<8xf32>
    %177 = vector.multi_reduction <add>, %171, %cst_208 [1] : vector<8x256xf32> to vector<8xf32>
    %178 = vector.shape_cast %177 : vector<8xf32> to vector<8x1xf32>
    %c0_209 = arith.constant 0 : index
    %c0_210 = arith.constant 0 : index
    %c1_211 = arith.constant 1 : index
    %179 = vector.load %arg4[%c0_209, %c0_210, %c1_211] : memref<1x8x2xf32, #tpu.memory_space<vmem>>, vector<1x8x1xf32>
    %180 = vector.shape_cast %179 : vector<1x8x1xf32> to vector<8x1xf32>
    %181 = vector.shape_cast %178 : vector<8x1xf32> to vector<1x8x1xf32>
    tpu.vector_store %arg4[%c0_209, %c0_210, %c1_211], %181 {strides = array<i32>} : memref<1x8x2xf32, #tpu.memory_space<vmem>>, vector<1x8x1xf32>,
    return
  }
  func.func @transform_0(%arg0: i32) -> (i32, i32, i32, i32) {
    %c0_i32 = arith.constant 0 : i32
    %c0_i32_0 = arith.constant 0 : i32
    %c0_i32_1 = arith.constant 0 : i32
    %c0_i32_2 = arith.constant 0 : i32
    return %arg0, %c0_i32, %c0_i32_0, %c0_i32_1 : i32, i32, i32, i32
  }
  func.func @transform_1(%arg0: i32) -> (i32, i32, i32) {
    %c0_i32 = arith.constant 0 : i32
    %c0_i32_0 = arith.constant 0 : i32
    %c0_i32_1 = arith.constant 0 : i32
    %c0_i32_2 = arith.constant 0 : i32
    return %c0_i32, %c0_i32_0, %c0_i32_1 : i32, i32, i32
  }
  func.func @transform_2(%arg0: i32) -> (i32, i32, i32, i32) {
    %c0_i32 = arith.constant 0 : i32
    %c0_i32_0 = arith.constant 0 : i32
    %c0_i32_1 = arith.constant 0 : i32
    %c0_i32_2 = arith.constant 0 : i32
    return %arg0, %c0_i32, %c0_i32_0, %c0_i32_1 : i32, i32, i32, i32
  }
  func.func @transform_3(%arg0: i32) -> (i32, i32, i32) {
    %c0_i32 = arith.constant 0 : i32
    %c0_i32_0 = arith.constant 0 : i32
    %c0_i32_1 = arith.constant 0 : i32
    return %arg0, %c0_i32, %c0_i32_0 : i32, i32, i32
  }
}

module attributes {stable_mosaic.version = 11 : i64} {
  func.func @_bn_relu_kernel(%arg0: i32, %arg1: i32, %arg2: memref<1x1x8x256xbf16, #tpu.memory_space<vmem>>, %arg3: memref<8x1xf32, #tpu.memory_space<vmem>>, %arg4: memref<8x1xf32, #tpu.memory_space<vmem>>, %arg5: memref<1x1x8x256xf32, #tpu.memory_space<vmem>>) attributes {dimension_semantics = [#tpu.dimension_semantics<parallel>, #tpu.dimension_semantics<parallel>], iteration_bounds = array<i64: 2, 4>, scalar_prefetch = 0 : i64, scratch_operands = 0 : i64, tpu.core_type = #tpu.core_type<tc>, window_params = [{transform_indices = @transform_0, window_bounds = array<i64: 1, 1, 8, 256>}, {pipeline_mode = #tpu.pipeline_mode<synchronous>, transform_indices = @transform_1, window_bounds = array<i64: 8, 1>}, {pipeline_mode = #tpu.pipeline_mode<synchronous>, transform_indices = @transform_2, window_bounds = array<i64: 8, 1>}, {transform_indices = @transform_3, window_bounds = array<i64: 1, 1, 8, 256>}]} {
    %c0 = arith.constant 0 : index
    %c0_0 = arith.constant 0 : index
    %c0_1 = arith.constant 0 : index
    %c0_2 = arith.constant 0 : index
    %0 = vector.load %arg2[%c0, %c0_0, %c0_1, %c0_2] : memref<1x1x8x256xbf16, #tpu.memory_space<vmem>>, vector<1x1x8x256xbf16>
    %1 = vector.shape_cast %0 : vector<1x1x8x256xbf16> to vector<8x256xbf16>
    %2 = arith.extf %1 : vector<8x256xbf16> to vector<8x256xf32>
    %c0_3 = arith.constant 0 : index
    %c0_4 = arith.constant 0 : index
    %3 = vector.load %arg3[%c0_3, %c0_4] : memref<8x1xf32, #tpu.memory_space<vmem>>, vector<8x1xf32>
    %4 = vector.broadcast %3 : vector<8x1xf32> to vector<8x256xf32>
    %5 = arith.mulf %2, %4 : vector<8x256xf32>
    %c0_5 = arith.constant 0 : index
    %c0_6 = arith.constant 0 : index
    %6 = vector.load %arg4[%c0_5, %c0_6] : memref<8x1xf32, #tpu.memory_space<vmem>>, vector<8x1xf32>
    %7 = vector.broadcast %6 : vector<8x1xf32> to vector<8x256xf32>
    %8 = arith.addf %5, %7 : vector<8x256xf32>
    %cst = arith.constant 0.000000e+00 : f32
    %9 = vector.broadcast %cst : f32 to vector<8x256xf32>
    %10 = arith.maximumf %8, %9 : vector<8x256xf32>
    %c0_7 = arith.constant 0 : index
    %c0_8 = arith.constant 0 : index
    %c0_9 = arith.constant 0 : index
    %c0_10 = arith.constant 0 : index
    %11 = vector.load %arg5[%c0_7, %c0_8, %c0_9, %c0_10] : memref<1x1x8x256xf32, #tpu.memory_space<vmem>>, vector<1x1x8x256xf32>
    %12 = vector.shape_cast %11 : vector<1x1x8x256xf32> to vector<8x256xf32>
    %13 = vector.shape_cast %10 : vector<8x256xf32> to vector<1x1x8x256xf32>
    tpu.vector_store %arg5[%c0_7, %c0_8, %c0_9, %c0_10], %13 {strides = array<i32>} : memref<1x1x8x256xf32, #tpu.memory_space<vmem>>, vector<1x1x8x256xf32>,
    return
  }
  func.func @transform_0(%arg0: i32, %arg1: i32) -> (i32, i32, i32, i32) {
    %c0_i32 = arith.constant 0 : i32
    %c0_i32_0 = arith.constant 0 : i32
    %c0_i32_1 = arith.constant 0 : i32
    return %arg0, %arg1, %c0_i32, %c0_i32_0 : i32, i32, i32, i32
  }
  func.func @transform_1(%arg0: i32, %arg1: i32) -> (i32, i32) {
    %c0_i32 = arith.constant 0 : i32
    %c0_i32_0 = arith.constant 0 : i32
    %c0_i32_1 = arith.constant 0 : i32
    return %c0_i32, %c0_i32_0 : i32, i32
  }
  func.func @transform_2(%arg0: i32, %arg1: i32) -> (i32, i32) {
    %c0_i32 = arith.constant 0 : i32
    %c0_i32_0 = arith.constant 0 : i32
    %c0_i32_1 = arith.constant 0 : i32
    return %c0_i32, %c0_i32_0 : i32, i32
  }
  func.func @transform_3(%arg0: i32, %arg1: i32) -> (i32, i32, i32, i32) {
    %c0_i32 = arith.constant 0 : i32
    %c0_i32_0 = arith.constant 0 : i32
    %c0_i32_1 = arith.constant 0 : i32
    return %arg0, %arg1, %c0_i32, %c0_i32_0 : i32, i32, i32, i32
  }
}

</mosaic_0001>

<bundles_post_ra>
// kernel: generator_decoder_block.3
= control target key start
LH: loop header
LB: loop body
LE: loop exit
PB: predicated region body
PF: predicated region fallthrough
CT: control target
= control target key end

     0   :  { %s441_s12 = smov 0   ;;  %s443_s13 = smov 0   ;;  %s498_s0 = inlined_call_operand.vmem [shape: bf16[2,4,8,256], index: 0, kind: input, shape index: {}]   ;;  %s499_s1 = inlined_call_operand.vmem [shape: f32[8,1], index: 1, kind: input, shape index: {}]   ;;  %s500_s2 = inlined_call_operand.vmem [shape: f32[8,1], index: 2, kind: input, shape index: {}]   ;;  %s501_s3 = inlined_call_operand.vmem [shape: f32[2,4,8,256], index: 3, kind: output, shape index: {}]  }
   0x1   :  { %s445_s14 = smov 0   ;;  %s447_s15 = smov 0  }
   0x2   :  { %s449_s16 = smov 0  }
   0x3 LB: > { %s22_s17 = sadd.s32 1, %s410_s14  ;;  %s25_s18 = sadd.s32 1, %s414_s15  ;;  %s418_s16 = sphi %s449_s16, %s13_s16   ;;  %s414_s15 = sphi %s447_s15, %s505_s15   ;;  %s410_s14 = sphi %s445_s14, %s504_s14   ;;  %s406_s13 = sphi %s443_s13, %s503_s13   ;;  %s402_s12 = sphi %s441_s12, %s502_s12  }
   0x4   : > { %p23_p0 = scmp.ge.s32.totalorder %s22_s17, 4  ;;  %p329_p1 = scmp.ge.s32.totalorder %s418_s16, 1 }
   0x5   : > { %p157_p2 = scmp.lt.s32.totalorder %s418_s16, 9 }
   0x6   : > { %s507_s17 = smov (%p23_p0, %s22_s17), 0  ;;  %s509_s18 = smov (!%p23_p0, %s25_s18), %s414_s15 }
   0x7   : > { %p158_p3 = pnand %p329_p1, %p157_p2  ;;  %p27_p4 = scmp.ge.s32.totalorder %s509_s18, 2 }
   0x8   : > { %v210_v0 = vld [vmem:[%s499_s1] sm:$0xff] (!%p158_p3)  ;;  %v420_v1 = vmov (!%p158_p3), 0   ;;  %p189_p5 = scmp.lt.s32.totalorder (!%p158_p3), %s406_s13, 1  ;;  %p191_p6 = scmp.lt.s32.totalorder (!%p158_p3), %s402_s12, 3 }
   0x9   : > { %s511_s18 = smov (%p27_p4, %s509_s18), 0  ;;  %161 = sbr.rel (%p158_p3) target bundleno = 148 (0x94), region = 32 }
   0xa   : > { %379 = vset.pattern.permute.xlu0 (!%p158_p3), %v420_v1  ;;  %v218_v2 = vld [vmem:[%s500_s2] sm:$0xff] (!%p158_p3) }
   0xb   : > { %213 = vperm.xlu0 (!%p158_p3), %379, %v210_v0  }
   0xf   : > { %221 = vperm.xlu0 (!%p158_p3), %379, %v218_v2  }
  0x10   : > { %s513_s13 = smov (!%p189_p5, %s406_s13), 1  ;;  %s515_s12 = smov (!%p191_p6, %s402_s12), 3 }
  0x11   : > { %s330_s23 = sshll.u32 %s515_s12, 1  ;;  %s331_s24 = sshll.u32 %s513_s13, 3 }
  0x12   : > { %s195_s25 = sadd.s32 %s331_s24, %s330_s23 }
  0x13   : > { %s332_s26 = sshll.u32 %s195_s25, 2  ;;  %s335_s30 = sshll.u32 %s195_s25, 3 }
  0x14   : > { %s197_s29 = scalar_lea.vmem %s498_s0, %s332_s26  ;;  %s206_s6 = scalar_lea.vmem %s501_s3, %s335_s30 }
  0x15   : > { %v207_v3 = vld [vmem:[%s197_s29] sm:$0xff] }
  0x16   : > { %v208_v4 = vunpack.c.l.bf16 %v207_v3  ;;  %v209_v5 = vunpack.c.h.bf16 %v207_v3 }
  0x8a   : > { %v214_v6 = vpop.permute.xlu0 %213 }
  0x8b   : > { %v216_v7 = vmul.f32 %v214_v6, %v208_v4  ;;  %v217_v8 = vmul.f32 %v214_v6, %v209_v5 }
  0x8e   : > { %v222_v9 = vpop.permute.xlu0 %221 }
  0x8f   : > { %v224_v10 = vadd.f32 %v222_v9, %v216_v7  ;;  %v225_v11 = vadd.f32 %v222_v9, %v217_v8 }
  0x91   : > { %v226_v12 = vmax.f32 %v224_v10, 0.0  ;;  %v227_v13 = vmax.f32 %v225_v11, 0.0 }
  0x93   : > { %228 = vst [vmem:[%s206_s6] sm:$0xff] %v226_v12  ;;  %229 = vst [vmem:[%s206_s6 + $0x8] sm:$0xff] %v227_v13 }
  0x94 PF: > { %s13_s16 = sadd.s32 1, %s418_s16   ;;  %s502_s12 = smov %s410_s14 }
  0x95   : > { %p10_p7 = scmp.ge.s32.totalorder %s13_s16, 10   ;;  %s503_s13 = smov %s414_s15 }
  0x96   : > { %s504_s14 = smov %s507_s17  ;;  %s505_s15 = smov %s511_s18 }
  0x97   :  { %12 = sbr.rel (!%p10_p7) target bundleno = 3 (0x3), region = 62 }

// kernel: generator_decoder_block.2
= control target key start
LH: loop header
LB: loop body
LE: loop exit
PB: predicated region body
PF: predicated region fallthrough
CT: control target
= control target key end

     0   :  { %s1609_s12 = smov 0   ;;  %s1784_s0 = inlined_call_operand.vmem [shape: bf16[2,9,4,256], index: 0, kind: input, shape index: {}]   ;;  %s1785_s1 = inlined_call_operand.vmem [shape: bf16[16,8,4], index: 1, kind: input, shape index: {}]   ;;  %s1786_s2 = inlined_call_operand.vmem [shape: bf16[2,4,8,256], index: 2, kind: output, shape index: {0}]   ;;  %s1787_s3 = inlined_call_operand.vmem [shape: f32[2,8,2], index: 3, kind: output, shape index: {1}]  }
   0x1 LB: > { %s1427_s13 = sadd.s32 4294967295, %s1586_s12   ;;  %p1431_p0 = scmp.ge.s32.totalorder %s1586_s12, 1  ;;  %s1586_s12 = sphi %s1609_s12, %s14_s12  }
   0x2   : > { %p140_p1 = scmp.lt.s32.totalorder %s1586_s12, 3 }
   0x4   : > { %p141_p2 = pnand %p1431_p0, %p140_p1 }
   0x5   : > { %p168_p3 = scmp.lt.s32.totalorder (!%p141_p2), %s1427_s13, 1  ;;  %v1588_v0 = vmov (!%p141_p2), 0   ;;  %vm198_vm0 = vcmask (!%p141_p2), 1041408   ;;  %v183_v8 = vld [vmem:[%s1785_s1] sm:$0xf] (!%p141_p2)  ;;  %vm194_vm1 = vcmask (!%p141_p2), 31744  }
   0x6   : > { %144 = sbr.rel (%p141_p2) target bundleno = 470 (0x1d6), region = 28  ;;  %237 = vmatprep.mubr.bf16.mxu0 (!%p141_p2), %v1588_v0  ;;  %509 = vmatprep.mubr.bf16.mxu1 (!%p141_p2), %v1588_v0  ;;  %v1454_v12 = vld [vmem:[%s1785_s1 + $0x10] sm:$0xf] (!%p141_p2)  ;;  %v1439_v17 = vld [vmem:[%s1785_s1 + $0x4] sm:$0xf] (!%p141_p2)  ;;  %vm1334_vm2 = vcmask (!%p141_p2), 7168  }
   0x7   : > { %v1459_v18 = vld [vmem:[%s1785_s1 + $0x14] sm:$0xf] (!%p141_p2)  ;;  %v1444_v23 = vld [vmem:[%s1785_s1 + $0x8] sm:$0xf] (!%p141_p2)  ;;  %v1463_v25 = vld [vmem:[%s1785_s1 + $0x18] sm:$0xf] (!%p141_p2) }
   0x8   : > { %v1449_v30 = vld [vmem:[%s1785_s1 + $0xc] sm:$0xf] (!%p141_p2)  ;;  %v1468_v31 = vld [vmem:[%s1785_s1 + $0x1c] sm:$0xf] (!%p141_p2)  ;;  %v1473_v35 = vld [vmem:[%s1785_s1 + $0x20] sm:$0xf] (!%p141_p2) }
   0x9   : > { %v1492_v36 = vld [vmem:[%s1785_s1 + $0x30] sm:$0xf] (!%p141_p2)  ;;  %v1478_v38 = vld [vmem:[%s1785_s1 + $0x24] sm:$0xf] (!%p141_p2)  ;;  %v1497_v39 = vld [vmem:[%s1785_s1 + $0x34] sm:$0xf] (!%p141_p2) }
   0xa   : > { %v1483_v40 = vld [vmem:[%s1785_s1 + $0x28] sm:$0xf] (!%p141_p2)  ;;  %v1502_v41 = vld [vmem:[%s1785_s1 + $0x38] sm:$0xf] (!%p141_p2)  ;;  %v1487_v42 = vld [vmem:[%s1785_s1 + $0x2c] sm:$0xf] (!%p141_p2) }
   0xb   : > { %v1507_v43 = vld [vmem:[%s1785_s1 + $0x3c] sm:$0xf] (!%p141_p2)  ;;  %vm1339_vm3 = vcmask (!%p141_p2), 15368  }
   0xd   : > { %s1789_s13 = smov (!%p168_p3, %s1427_s13), 1 }
   0xe   : > { %s1570_s14 = smul.u32 36, %s1789_s13  ;;  %s1517_s25 = sshll.u32 %s1789_s13, 5 }
   0xf   : > { %s1771_s28 = scalar_lea.vmem %s1786_s2, %s1517_s25  ;;  %s1435_s29 = sshll.u32 %s1789_s13, 3 }
  0x10   : > { %s1625_s17 = scalar_lea.vmem %s1784_s0, %s1570_s14  ;;  %s181_s5 = scalar_lea.vmem %s1787_s3, %s1435_s29 }
  0x11   : > { %v1436_v1 = vld.sshfl [vmem:[%s1625_s17] sm:$0x33 pattern:$0x76325410] }
  0x12   : > { %v1628_v2 = vcombine.high %v1436_v1, %v1436_v1  ;;  %v1456_v3 = vld.sshfl [vmem:[%s1625_s17 + $0x10] sm:$0x33 pattern:$0x76325410]  ;;  %v1632_v4 = vsel %vm198_vm0, %v1436_v1, 0 }
  0x13   : > { %v1634_v5 = vcombine.high %v1456_v3, %v1456_v3  ;;  %v1637_v6 = vsel %vm198_vm0, %v1456_v3, 0  ;;  %v1441_v7 = vld.sshfl [vmem:[%s1625_s17 + $0x4] sm:$0x33 pattern:$0x76325410] }
  0x14   : > { %1437 = vmatprep.subr.msk.bf16.mxu0 %vm198_vm0, %v1628_v2  ;;  %v1645_v9 = vcombine.high %v1441_v7, %v1441_v7  ;;  %v1446_v10 = vld.sshfl [vmem:[%s1625_s17 + $0x8] sm:$0x33 pattern:$0x76325410]  ;;  %v1659_v13 = vsel %vm198_vm0, %v1441_v7, 0 }
  0x15   : > { %1457 = vmatprep.subr.msk.bf16.mxu1 %vm198_vm0, %v1634_v5  ;;  %206 = vmatpush1.bf16.msra.mxu0 %v1632_v4  ;;  %v1465_v11 = vld.sshfl [vmem:[%s1625_s17 + $0x14] sm:$0x33 pattern:$0x76325410]  ;;  %v329_v14 = vcombine.high %v1446_v10, %v1446_v10  ;;  %v334_v19 = vsel %vm198_vm0, %v1446_v10, 0 }
  0x16   : > { %478 = vmatpush1.bf16.msra.mxu1 %v1637_v6  ;;  %1442 = vmatprep.subr.msk.bf16.mxu0 %vm198_vm0, %v1645_v9  ;;  %v601_v15 = vcombine.high %v1465_v11, %v1465_v11  ;;  %v1451_v16 = vld.sshfl [vmem:[%s1625_s17 + $0xc] sm:$0x33 pattern:$0x76325410]  ;;  %v606_v20 = vsel %vm198_vm0, %v1465_v11, 0 }
  0x17   : > { %1461 = vmatprep.subr.msk.bf16.mxu1 %vm198_vm0, %v1628_v2  ;;  %v398_v21 = vcombine.high %v1451_v16, %v1451_v16  ;;  %v1475_v22 = vld.sshfl [vmem:[%s1625_s17 + $0x18] sm:$0x33 pattern:$0x76325410]  ;;  %v403_v26 = vsel %vm198_vm0, %v1451_v16, 0 }
  0x18   : > { %1438 = vmatmul.mubr.msk.bf16.vlgmr.msra.gmra.mrb[0].mxu0 %vm194_vm1, %v183_v8  ;;  %v1494_v24 = vld.sshfl [vmem:[%s1625_s17 + $0x20] sm:$0x33 pattern:$0x76325410]  ;;  %v738_v27 = vcombine.high %v1475_v22, %v1475_v22  ;;  %v743_v32 = vsel %vm198_vm0, %v1475_v22, 0 }
  0x19   : > { %1458 = vmatmul.mubr.msk.bf16.vlgmr.msra.gmra.mrb[0].mxu1 %vm194_vm1, %v1454_v12  ;;  %271 = vmatpush1.bf16.msra.mxu0 %v1659_v13  ;;  %v1009_v28 = vcombine.high %v1494_v24, %v1494_v24  ;;  %v1480_v29 = vld.sshfl [vmem:[%s1625_s17 + $0x1c] sm:$0x33 pattern:$0x76325410]  ;;  %v1014_v33 = vsel %vm198_vm0, %v1494_v24, 0 }
  0x1a   : > { %543 = vmatpush1.bf16.msra.mxu1 %v1632_v4  ;;  %302 = vmatprep.mubr.bf16.mxu0 %v1588_v0  ;;  %v804_v34 = vcombine.high %v1480_v29, %v1480_v29  ;;  %v809_v37 = vsel %vm198_vm0, %v1480_v29, 0 }
  0x1b   : > { %574 = vmatprep.mubr.bf16.mxu1 %v1588_v0  ;;  %1447 = vmatprep.subr.msk.bf16.mxu0 %vm198_vm0, %v329_v14 }
  0x1c   : > { %1466 = vmatprep.subr.msk.bf16.mxu1 %vm198_vm0, %v601_v15 }
  0x24   : > { %1443 = vmatmul.mubr.msk.bf16.vlgmr.msra.gmra.mrb[0].mxu0 %vm194_vm1, %v1439_v17 }
  0x25   : > { %1462 = vmatmul.mubr.msk.bf16.vlgmr.msra.gmra.mrb[0].mxu1 %vm194_vm1, %v1459_v18  ;;  %340 = vmatpush1.bf16.msra.mxu0 %v334_v19 }
  0x26   : > { %612 = vmatpush1.bf16.msra.mxu1 %v606_v20  ;;  %371 = vmatprep.mubr.bf16.mxu0 %v1588_v0 }
  0x27   : > { %643 = vmatprep.mubr.bf16.mxu1 %v1588_v0  ;;  %1452 = vmatprep.subr.msk.bf16.mxu0 %vm198_vm0, %v398_v21 }
  0x28   : > { %1471 = vmatprep.subr.msk.bf16.mxu1 %vm198_vm0, %v329_v14 }
  0x30   : > { %1448 = vmatmul.mubr.msk.bf16.vlgmr.msra.gmra.mrb[0].mxu0 %vm194_vm1, %v1444_v23 }
  0x31   : > { %1467 = vmatmul.mubr.msk.bf16.vlgmr.msra.gmra.mrb[0].mxu1 %vm194_vm1, %v1463_v25  ;;  %409 = vmatpush1.bf16.msra.mxu0 %v403_v26 }
  0x32   : > { %680 = vmatpush1.bf16.msra.mxu1 %v334_v19  ;;  %440 = vmatprep.mubr.bf16.mxu0 %v1588_v0 }
  0x33   : > { %711 = vmatprep.mubr.bf16.mxu1 %v1588_v0  ;;  %1476 = vmatprep.subr.msk.bf16.mxu0 %vm198_vm0, %v738_v27 }
  0x34   : > { %1495 = vmatprep.subr.msk.bf16.mxu1 %vm198_vm0, %v1009_v28 }
  0x3c   : > { %1453 = vmatmul.mubr.msk.bf16.vlgmr.msra.gmra.mrb[0].mxu0 %vm194_vm1, %v1449_v30 }
  0x3d   : > { %1472 = vmatmul.mubr.msk.bf16.vlgmr.msra.gmra.mrb[0].mxu1 %vm194_vm1, %v1468_v31  ;;  %749 = vmatpush1.bf16.msra.mxu0 %v743_v32 }
  0x3e   : > { %1020 = vmatpush1.bf16.msra.mxu1 %v1014_v33  ;;  %780 = vmatprep.mubr.bf16.mxu0 %v1588_v0 }
  0x3f   : > { %1051 = vmatprep.mubr.bf16.mxu1 %v1588_v0  ;;  %1481 = vmatprep.subr.msk.bf16.mxu0 %vm198_vm0, %v804_v34 }
  0x40   : > { %1500 = vmatprep.subr.msk.bf16.mxu1 %vm198_vm0, %v738_v27 }
  0x44   : > { %1477 = vmatmul.mubr.msk.bf16.vlgmr.msra.gmra.mrb[4].mxu0 %vm194_vm1, %v1473_v35 }
  0x45   : > { %1496 = vmatmul.mubr.msk.bf16.vlgmr.msra.gmra.mrb[4].mxu1 %vm194_vm1, %v1492_v36  ;;  %815 = vmatpush1.bf16.msra.mxu0 %v809_v37 }
  0x46   : > { %1085 = vmatpush1.bf16.msra.mxu1 %v743_v32  ;;  %846 = vmatprep.mubr.bf16.mxu0 %v1588_v0 }
  0x47   : > { %1116 = vmatprep.mubr.bf16.mxu1 %v1588_v0  ;;  %1485 = vmatprep.subr.msk.bf16.mxu0 %vm198_vm0, %v1628_v2 }
  0x48   : > { %1505 = vmatprep.subr.msk.bf16.mxu1 %vm198_vm0, %v1634_v5 }
  0x50   : > { %1482 = vmatmul.mubr.msk.bf16.vlgmr.msra.gmra.mrb[4].mxu0 %vm194_vm1, %v1478_v38 }
  0x51   : > { %1501 = vmatmul.mubr.msk.bf16.vlgmr.msra.gmra.mrb[4].mxu1 %vm194_vm1, %v1497_v39  ;;  %883 = vmatpush1.bf16.msra.mxu0 %v1632_v4 }
  0x52   : > { %1153 = vmatpush1.bf16.msra.mxu1 %v1637_v6  ;;  %914 = vmatprep.mubr.bf16.mxu0 %v1588_v0 }
  0x53   : > { %1184 = vmatprep.mubr.bf16.mxu1 %v1588_v0  ;;  %1490 = vmatprep.subr.msk.bf16.mxu0 %vm198_vm0, %v1645_v9 }
  0x54   : > { %1509 = vmatprep.subr.msk.bf16.mxu1 %vm198_vm0, %v1628_v2 }
  0x5c   : > { %1486 = vmatmul.mubr.msk.bf16.vlgmr.msra.gmra.mrb[4].mxu0 %vm194_vm1, %v1483_v40 }
  0x5d   : > { %1506 = vmatmul.mubr.msk.bf16.vlgmr.msra.gmra.mrb[4].mxu1 %vm194_vm1, %v1502_v41  ;;  %951 = vmatpush1.bf16.msra.mxu0 %v1659_v13 }
  0x5e   : > { %1221 = vmatpush1.bf16.msra.mxu1 %v1632_v4  ;;  %982 = vmatprep.mubr.bf16.mxu0 %v1588_v0 }
  0x5f   : > { %1252 = vmatprep.mubr.bf16.mxu1 %v1588_v0 }
  0x68   : > { %1491 = vmatmul.mubr.msk.bf16.vlgmr.msra.gmra.mrb[4].mxu0 %vm194_vm1, %v1487_v42 }
  0x69   : > { %1510 = vmatmul.mubr.msk.bf16.vlgmr.msra.gmra.mrb[4].mxu1 %vm194_vm1, %v1507_v43 }
 0x10f   : > { %v442_v44 = vpop.f32.mrb[0].mxu0 }
 0x110   : > { %v1317_v45 = vmul.f32 %v442_v44, %v442_v44  ;;  %v713_v46 = vpop.f32.mrb[0].mxu1  ;;  %v444_v47 = vpop.f32.mrb[1].mxu0 }
 0x111   : > { %v1311_v48 = vadd.f32 %v713_v46, %v442_v44  ;;  %v1319_v49 = vmul.f32 %v713_v46, %v713_v46  ;;  %v1518_v50 = vpack.c.bf16 %v444_v47, %v442_v44  ;;  %v1318_v51 = vmul.f32 %v444_v47, %v444_v47  ;;  %v715_v52 = vpop.f32.mrb[1].mxu1  ;;  %v446_v53 = vpop.f32.mrb[2].mxu0 }
 0x112   : > { %v1519_v54 = vpack.c.bf16 %v715_v52, %v713_v46  ;;  %v1314_v55 = vadd.f32 %v715_v52, %v444_v47  ;;  %v1320_v56 = vmul.f32 %v715_v52, %v715_v52  ;;  %v717_v57 = vpop.f32.mrb[2].mxu1  ;;  %v447_v58 = vpop.f32.mrb[3].mxu0 }
 0x113   : > { %v1325_v59 = vadd.f32 %v1319_v49, %v1317_v45  ;;  %1307 = vst [vmem:[%s1771_s28] sm:$0xff] %v1518_v50  ;;  %v718_v60 = vpop.f32.mrb[3].mxu1 }
 0x114   : > { %1308 = vst [vmem:[%s1771_s28 + $0x8] sm:$0xff] %v1519_v54  ;;  %v1328_v61 = vadd.f32 %v1320_v56, %v1318_v51 }
 0x13b   : > { %v984_v62 = vpop.f32.mrb[4].mxu0 }
 0x13c   : > { %v1312_v63 = vadd.f32 %v1311_v48, %v984_v62  ;;  %v1321_v0 = vmul.f32 %v984_v62, %v984_v62  ;;  %v1254_v1 = vpop.f32.mrb[4].mxu1  ;;  %v986_v2 = vpop.f32.mrb[5].mxu0 }
 0x13d   : > { %v1520_v3 = vpack.c.bf16 %v986_v2, %v984_v62  ;;  %v1315_v4 = vadd.f32 %v1314_v55, %v986_v2  ;;  %v1322_v5 = vmul.f32 %v986_v2, %v986_v2  ;;  %v1256_v6 = vpop.f32.mrb[5].mxu1  ;;  %v988_v7 = vpop.f32.mrb[6].mxu0  ;;  %v1323_v8 = vmul.f32 %v1254_v1, %v1254_v1 }
 0x13e   : > { %v1521_v9 = vpack.c.bf16 %v1256_v6, %v1254_v1  ;;  %v1258_v10 = vpop.f32.mrb[6].mxu1  ;;  %v989_v11 = vpop.f32.mrb[7].mxu0  ;;  %v1313_v12 = vadd.f32 %v1312_v63, %v1254_v1  ;;  %v1326_v13 = vadd.f32 %v1325_v59, %v1321_v0  ;;  %v1324_v14 = vmul.f32 %v1256_v6, %v1256_v6 }
 0x13f   : > { %1309 = vst [vmem:[%s1771_s28 + $0x10] sm:$0xff] %v1520_v3  ;;  %v1259_v15 = vpop.f32.mrb[7].mxu1  ;;  %v1316_v16 = vadd.f32 %v1315_v4, %v1256_v6  ;;  %v1329_v17 = vadd.f32 %v1328_v61, %v1322_v5 }
 0x140   : > { %1310 = vst [vmem:[%s1771_s28 + $0x18] sm:$0xff] %v1521_v9  ;;  %v1327_v18 = vadd.f32 %v1326_v13, %v1323_v8 }
 0x141   : > { %v1331_v19 = vadd.f32 %v1316_v16, %v1313_v12  ;;  %v1330_v20 = vadd.f32 %v1329_v17, %v1324_v14 }
 0x143   : > { %1332 = vadd.xlane.f32.xlu0 %v1331_v19  ;;  %v1336_v21 = vadd.f32 %v1330_v20, %v1327_v18 }
 0x147   : > { %1337 = vadd.xlane.f32.xlu0 %v1336_v21 }
 0x1d0   : > { %v1333_v22 = vpop.xlane.xlu0 %1332 }
 0x1d1   : > { %1335 = vst.msk [vmem:[%s181_s5] sm:$0xff] %vm1334_vm2, %v1333_v22 }
 0x1d4   : > { %v1338_v23 = vpop.xlane.xlu0 %1337 }
 0x1d5   : > { %1340 = vst.msk [vmem:[%s181_s5] sm:$0xff] %vm1339_vm3, %v1338_v23 }
 0x1d6 PF: > { %s14_s12 = sadd.s32 1, %s1586_s12  }
 0x1d7   : > { %p11_p4 = scmp.ge.s32.totalorder %s14_s12, 4  }
 0x1d9   :  { %13 = sbr.rel (!%p11_p4) target bundleno = 1 (0x1), region = 96 }

</bundles_post_ra>
